<compile_context>
chip_gen: v7x
topology: tpu7x:2x2x1
jax: 0.10.0
libtpu: 0.0.40
codegen_flags: <defaults>
</compile_context>

<pallas_src>
import functools
import math

import jax
import jax.numpy as jnp
from jax.experimental import pallas as pl
from jax.experimental.pallas import tpu as pltpu


# ----------------------------------------------------------------------------
# Generation-aware configuration helpers
# ----------------------------------------------------------------------------
def _vmem_budget():
    try:
        cap = int(pltpu.get_tpu_info().vmem_capacity_bytes)
    except Exception:
        cap = 64 * 1024 * 1024  # conservative (v7x per-core) figure
    return max(32 * 1024 * 1024, int(cap * 0.70))


_VMEM_BUDGET = _vmem_budget()


def _probe_buffered1():
    """Check whether BlockSpec(pipeline_mode=pl.Buffered(1)) works here."""
    try:
        def k(c_ref, x_ref, o_ref):
            o_ref[...] = x_ref[...] + c_ref[...]

        c = jnp.ones((8, 128), jnp.float32)
        x = jnp.ones((16, 128), jnp.float32)
        out = pl.pallas_call(
            k,
            out_shape=jax.ShapeDtypeStruct((16, 128), jnp.float32),
            grid=(2,),
            in_specs=[pl.BlockSpec((8, 128), lambda i: (0, 0),
                                   pipeline_mode=pl.Buffered(1)),
                      pl.BlockSpec((8, 128), lambda i: (i, 0))],
            out_specs=pl.BlockSpec((8, 128), lambda i: (i, 0)),
        )(c, x)
        jax.block_until_ready(out)
        return True
    except Exception:
        return False


_HAS_BUF1 = _probe_buffered1()


def _const_spec(shape, index_map):
    """Spec for a grid-invariant block; single-buffered when supported."""
    if _HAS_BUF1:
        return pl.BlockSpec(shape, index_map, pipeline_mode=pl.Buffered(1))
    return pl.BlockSpec(shape, index_map)


def _cost(flops, bytes_accessed):
    try:
        return pl.CostEstimate(flops=int(flops), transcendentals=0,
                               bytes_accessed=int(bytes_accessed))
    except Exception:
        return None


def _pick_tile(total, mult, cap):
    """Largest tile <= cap, multiple of `mult`, minimizing padded total."""
    cap = max(mult, min(cap, max(total, mult)))
    start = (cap // mult) * mult
    best = None
    t = start
    while t >= mult:
        n = -(-total // t)
        padded = n * t
        if best is None or padded < best[0]:
            best = (padded, t, n)
        if padded == total:
            break
        t -= mult
    _, t, n = best
    return t, n


# ----------------------------------------------------------------------------
# Kernels
# ----------------------------------------------------------------------------
def _apply_act(y, act):
    if act == "relu":
        return jnp.maximum(y, 0.0)
    if act == "leaky":
        return jnp.where(y >= 0.0, y, 0.1 * y)
    return y


def _make_gemm_kernel(act):
    def kernel(a_ref, w_ref, s_ref, b_ref, o_ref):
        y = jnp.dot(a_ref[...], w_ref[...], preferred_element_type=jnp.float32)
        y = y * s_ref[...] + b_ref[...]
        o_ref[...] = _apply_act(y, act).astype(o_ref.dtype)
    return kernel


_GEMM_KERNELS = {a: _make_gemm_kernel(a) for a in ("none", "relu", "leaky")}


def _make_conv3x3_kernel(act, has_res, d, TRo, W, Cin, Cout):
    """Implicit-GEMM 3x3 stride-1 'same' conv with fused BN/act/residual."""
    KH = KW = 3
    halo = (KH - 1) * d

    def kernel(*refs):
        if has_res:
            xm_ref, xh_ref, w_ref, s_ref, b_ref, r_ref, o_ref, xbuf, acc = refs
        else:
            xm_ref, xh_ref, w_ref, s_ref, b_ref, o_ref, xbuf, acc = refs
            r_ref = None
        # Assemble the tile rows + vertical halo once in VMEM scratch.
        xbuf[0:TRo] = xm_ref[...]
        xbuf[TRo:TRo + halo] = xh_ref[...]
        acc[...] = jnp.zeros((TRo * W, Cout), jnp.float32)

        def tap(kh, carry):
            row0 = kh * d
            for kw in range(KW):
                win = xbuf[pl.ds(row0, TRo), kw * d:kw * d + W, :]
                a2 = win.reshape(TRo * W, Cin)
                acc[...] += jnp.dot(a2, w_ref[kh * KW + kw],
                                    preferred_element_type=jnp.float32)
            return carry

        jax.lax.fori_loop(0, KH, tap, 0)

        y = acc[...] * s_ref[...] + b_ref[...]
        y = y.reshape(TRo, W, Cout)
        if has_res:
            y = y + r_ref[...].astype(jnp.float32)
        o_ref[...] = _apply_act(y, act).astype(o_ref.dtype)

    return kernel


def _make_maxpool_kernel(TRo):
    def kernel(p_ref, h_ref, o_ref):
        p = p_ref[...]                 # (TRo, 2, Wo, C): rows 2r, 2r+1
        nxt = h_ref[:, 0]              # (1, Wo, C): row 2*(tile_end)
        if TRo > 1:
            below = jnp.concatenate([p[1:, 0], nxt], axis=0)   # rows 2r+2
        else:
            below = nxt
        o_ref[...] = jnp.maximum(jnp.maximum(p[:, 0], p[:, 1]), below)
    return kernel


def _sigmoid_kernel(x_ref, o_ref):
    o_ref[...] = jax.nn.sigmoid(x_ref[...])


def _sl1_kernel(p_ref, t_ref, m_ref, ls_ref, ms_ref, lacc, macc):
    # masked smooth-L1 (sigma=1); mask streamed as (TR,1), broadcast in-kernel.
    j = pl.program_id(1)

    @pl.when(j == 0)
    def _():
        lacc[...] = jnp.zeros_like(lacc)
        macc[...] = jnp.zeros_like(macc)

    m = m_ref[...]                              # (TR, 1)
    d = m * (p_ref[...] - t_ref[...])           # (TR, c)
    ad = jnp.abs(d)
    il = jnp.where(ad < 1.0, 0.5 * d * d, ad - 0.5)
    lacc[...] += jnp.sum(il, axis=0, keepdims=True)
    macc[...] += jnp.sum(m, axis=0, keepdims=True)

    @pl.when(j == pl.num_programs(1) - 1)
    def _():
        ls_ref[...] = lacc[...]
        ms_ref[...] = macc[...]


def _bce_logits_kernel(z_ref, t_ref, o_ref, acc):
    # BCE with logits: softplus(z) - z*t, numerically stable.
    j = pl.program_id(1)

    @pl.when(j == 0)
    def _():
        acc[...] = jnp.zeros_like(acc)

    z = z_ref[...]
    t = t_ref[...]
    il = jnp.maximum(z, 0.0) - z * t + jnp.log1p(jnp.exp(-jnp.abs(z)))
    acc[...] += jnp.sum(il, axis=0, keepdims=True)

    @pl.when(j == pl.num_programs(1) - 1)
    def _():
        o_ref[...] = acc[...]


# ----------------------------------------------------------------------------
# Implicit-GEMM 3x3 "same" conv
# ----------------------------------------------------------------------------
@functools.lru_cache(maxsize=None)
def _build_conv3x3(N, H, W, Cin, Cout, d, act, has_res, out_dtype_name):
    out_dtype = jnp.dtype(out_dtype_name)
    KH = KW = 3
    pad = d
    halo = (KH - 1) * d
    Wp = W + 2 * pad
    budget = _VMEM_BUDGET

    def est(tr):
        b = 2 * tr * Wp * Cin * 2                 # main input (double buffered)
        b += 2 * halo * Wp * Cin * 2              # halo input
        b += KH * KW * Cin * Cout * 2 * (1 if _HAS_BUF1 else 2)
        b += (tr + halo) * Wp * Cin * 2           # xbuf scratch
        b += tr * W * Cout * 4                    # f32 accumulator
        b += 2 * tr * W * Cout * out_dtype.itemsize
        if has_res:
            b += 2 * tr * W * Cout * 2
        b += 3 * tr * W * Cin * 2                 # transient tap windows
        b += 2 * (1 << 20)
        return b

    cap = 256
    cap = min(cap, max(8, (((H + 1) // 2) + 7) // 8 * 8))   # allow >=2 tiles
    while cap > 8 and est(cap) > budget:
        cap -= 8
    TRo, nt = _pick_tile(H, 8, cap)               # multiple of 8 => % (2d) == 0
    Hpad = TRo * nt

    kernel = _make_conv3x3_kernel(act, has_res, d, TRo, W, Cin, Cout)

    in_specs = [
        pl.BlockSpec((None, TRo, Wp, Cin), lambda n, i: (n, i, 0, 0)),
        pl.BlockSpec((None, halo, Wp, Cin),
                     lambda n, i: (n, (i + 1) * TRo // halo, 0, 0)),
        _const_spec((KH * KW, Cin, Cout), lambda n, i: (0, 0, 0)),
        _const_spec((1, Cout), lambda n, i: (0, 0)),
        _const_spec((1, Cout), lambda n, i: (0, 0)),
    ]
    if has_res:
        in_specs.append(pl.BlockSpec((None, TRo, W, Cout),
                                     lambda n, i: (n, i, 0, 0)))

    flops = 2 * N * Hpad * W * (KH * KW * Cin) * Cout
    bytes_acc = (N * (Hpad + halo) * Wp * Cin * 2
                 + KH * KW * Cin * Cout * 2
                 + N * Hpad * W * Cout * out_dtype.itemsize
                 + (N * Hpad * W * Cout * 2 if has_res else 0))

    call = pl.pallas_call(
        kernel,
        out_shape=jax.ShapeDtypeStruct((N, Hpad, W, Cout), out_dtype),
        grid_spec=pltpu.PrefetchScalarGridSpec(
            num_scalar_prefetch=0,
            grid=(N, nt),
            in_specs=in_specs,
            out_specs=pl.BlockSpec((None, TRo, W, Cout),
                                   lambda n, i: (n, i, 0, 0)),
            scratch_shapes=[pltpu.VMEM((TRo + halo, Wp, Cin), jnp.bfloat16),
                            pltpu.VMEM((TRo * W, Cout), jnp.float32)]),
        compiler_params=pltpu.CompilerParams(
            dimension_semantics=("parallel", "parallel"),
            vmem_limit_bytes=budget),
        cost_estimate=_cost(flops, bytes_acc),
    )
    return jax.jit(call), TRo, nt, Hpad


def conv3x3_same(x, p, d, act, residual, out_dtype):
    N, H, W, Cin = x.shape
    Cout = p["cout"]
    call, TRo, nt, Hpad = _build_conv3x3(N, H, W, Cin, Cout, d, act,
                                         residual is not None,
                                         jnp.dtype(out_dtype).name)
    pad = d
    xb = x if x.dtype == jnp.bfloat16 else x.astype(jnp.bfloat16)
    xp = jnp.pad(xb, ((0, 0), (pad, pad + Hpad - H), (pad, pad), (0, 0)))
    args = [xp, xp, p["w"], p["scale"], p["bias"]]
    if residual is not None:
        r = residual
        if Hpad != H:
            r = jnp.pad(r, ((0, 0), (0, Hpad - H), (0, 0), (0, 0)))
        args.append(r)
    out = call(*args)
    if Hpad != H:
        out = out[:, :H]
    return out


# ----------------------------------------------------------------------------
# Fallback GEMM conv (1x1 convs, 7x7-s2 stem, the single 3x3-s2 conv)
# ----------------------------------------------------------------------------
def pallas_gemm_bn_act(a, w, scale, bias, act, out_dtype):
    M, K = a.shape
    Cout = w.shape[1]
    out_dtype = jnp.dtype(out_dtype)
    budget = _VMEM_BUDGET

    def est(tm):
        return (2 * tm * K * 2 + K * Cout * 2 * (1 if _HAS_BUF1 else 2)
                + 2 * tm * Cout * out_dtype.itemsize + tm * Cout * 4
                + (1 << 20))

    cap = 1024
    while cap > 8 and est(cap) > budget:
        cap -= 8
    TM, nt = _pick_tile(M, 8, cap)
    Mp = TM * nt
    if Mp != M:
        a = jnp.pad(a, ((0, Mp - M), (0, 0)))

    out = pl.pallas_call(
        _GEMM_KERNELS[act],
        out_shape=jax.ShapeDtypeStruct((Mp, Cout), out_dtype),
        grid_spec=pltpu.PrefetchScalarGridSpec(
            num_scalar_prefetch=0,
            grid=(nt,),
            in_specs=[pl.BlockSpec((TM, K), lambda i: (i, 0)),
                      _const_spec((K, Cout), lambda i: (0, 0)),
                      _const_spec((1, Cout), lambda i: (0, 0)),
                      _const_spec((1, Cout), lambda i: (0, 0))],
            out_specs=pl.BlockSpec((TM, Cout), lambda i: (i, 0))),
        compiler_params=pltpu.CompilerParams(
            dimension_semantics=("parallel",),
            vmem_limit_bytes=budget),
        cost_estimate=_cost(2 * Mp * K * Cout,
                            Mp * K * 2 + K * Cout * 2
                            + Mp * Cout * out_dtype.itemsize),
    )(a, w, scale, bias)
    return out if Mp == M else out[:M]


def conv2d(x, p, *, stride=1, dilation=1, padding=0, act="none",
           residual=None, out_dtype=jnp.bfloat16):
    """NHWC conv with fused folded-BN + activation (+ optional residual)."""
    N, H, W, Cin = x.shape
    KH, KW, Cout = p["kh"], p["kw"], p["cout"]

    if KH == 3 and KW == 3 and stride == 1 and padding == dilation:
        return conv3x3_same(x, p, dilation, act, residual, out_dtype)

    assert residual is None
    Ho = (H + 2 * padding - dilation * (KH - 1) - 1) // stride + 1
    Wo = (W + 2 * padding - dilation * (KW - 1) - 1) // stride + 1
    xb = x if x.dtype == jnp.bfloat16 else x.astype(jnp.bfloat16)

    if KH == 1 and KW == 1 and padding == 0:
        xs = xb if stride == 1 else xb[:, ::stride, ::stride, :]
        a = xs.reshape(N * Ho * Wo, Cin)
    else:
        xp = jnp.pad(xb, ((0, 0), (padding, padding), (padding, padding), (0, 0)))
        cols = []
        for kh in range(KH):
            for kw in range(KW):
                h0, w0 = kh * dilation, kw * dilation
                patch = jax.lax.slice(
                    xp, (0, h0, w0, 0),
                    (N, h0 + (Ho - 1) * stride + 1,
                     w0 + (Wo - 1) * stride + 1, Cin),
                    (1, stride, stride, 1))
                cols.append(patch)
        a = jnp.concatenate(cols, axis=-1).reshape(N * Ho * Wo, KH * KW * Cin)

    w2 = p["w"].reshape(KH * KW * Cin, Cout)
    y = pallas_gemm_bn_act(a, w2, p["scale"], p["bias"], act, out_dtype)
    return y.reshape(N, Ho, Wo, Cout)


# ----------------------------------------------------------------------------
# MaxPool 3x3 stride 2 (pad 1)
# ----------------------------------------------------------------------------
def maxpool_3x3_s2(x):
    N, H, W, C = x.shape
    Ho = (H - 1) // 2 + 1
    Wo = (W - 1) // 2 + 1
    TRo, nt = _pick_tile(Ho, 1, 128)
    Hopad = TRo * nt
    Hp = 2 * Hopad + 2
    xp = jnp.pad(x, ((0, 0), (1, Hp - H - 1), (1, 1), (0, 0)),
                 constant_values=-1e30)
    # horizontal 3-tap max (fused elementwise in XLA, single pass)
    taps = [jax.lax.slice(xp, (0, 0, kw, 0),
                          (N, Hp, kw + 2 * (Wo - 1) + 1, C),
                          (1, 1, 2, 1)) for kw in range(3)]
    hmax = jnp.maximum(jnp.maximum(taps[0], taps[1]), taps[2])  # (N, Hp, Wo, C)
    pairs = hmax.reshape(N, Hp // 2, 2, Wo, C)

    out = pl.pallas_call(
        _make_maxpool_kernel(TRo),
        out_shape=jax.ShapeDtypeStruct((N, Hopad, Wo, C), x.dtype),
        grid_spec=pltpu.PrefetchScalarGridSpec(
            num_scalar_prefetch=0,
            grid=(N, nt),
            in_specs=[pl.BlockSpec((None, TRo, 2, Wo, C),
                                   lambda n, i: (n, i, 0, 0, 0)),
                      pl.BlockSpec((None, 1, 2, Wo, C),
                                   lambda n, i: (n, (i + 1) * TRo, 0, 0, 0))],
            out_specs=pl.BlockSpec((None, TRo, Wo, C),
                                   lambda n, i: (n, i, 0, 0))),
        compiler_params=pltpu.CompilerParams(
            dimension_semantics=("parallel", "parallel")),
    )(pairs, pairs)
    return out if Hopad == Ho else out[:, :Ho]


# ----------------------------------------------------------------------------
# Sigmoid and losses
# ----------------------------------------------------------------------------
def pallas_sigmoid(x):
    shape = x.shape
    flat = x.reshape(-1).astype(jnp.float32)
    L = flat.shape[0]
    rows = pl.cdiv(L, 128)
    TR, nt = _pick_tile(rows, 8, 1024)
    rows_p = TR * nt
    padn = rows_p * 128 - L
    xp = jnp.pad(flat, (0, padn)) if padn else flat
    xp = xp.reshape(rows_p, 128)
    out = pl.pallas_call(
        _sigmoid_kernel,
        out_shape=jax.ShapeDtypeStruct((rows_p, 128), jnp.float32),
        grid_spec=pltpu.PrefetchScalarGridSpec(
            num_scalar_prefetch=0, grid=(nt,),
            in_specs=[pl.BlockSpec((TR, 128), lambda i: (i, 0))],
            out_specs=pl.BlockSpec((TR, 128), lambda i: (i, 0))),
        compiler_params=pltpu.CompilerParams(dimension_semantics=("parallel",)),
    )(xp)
    return out.reshape(-1)[:L].reshape(shape)


def masked_smooth_l1_loss(map_pred, map_target, mask):
    """sigma=1, normalize=True, reduce=True.  pred/target NHWC, mask (B,H,W,1)."""
    B, H, W, c = map_pred.shape
    HW = H * W
    p = map_pred.reshape(B, HW, c).astype(jnp.float32)
    t = map_target.reshape(B, HW, c).astype(jnp.float32)
    m = mask.reshape(B, HW, 1).astype(jnp.float32)
    TR, nt = _pick_tile(HW, 8, 2048)
    HWp = TR * nt
    if HWp != HW:
        padr = HWp - HW
        p = jnp.pad(p, ((0, 0), (0, padr), (0, 0)))
        t = jnp.pad(t, ((0, 0), (0, padr), (0, 0)))
        m = jnp.pad(m, ((0, 0), (0, padr), (0, 0)))

    loss_sum, mask_sum = pl.pallas_call(
        _sl1_kernel,
        out_shape=(jax.ShapeDtypeStruct((B, 1, c), jnp.float32),
                   jax.ShapeDtypeStruct((B, 1, 1), jnp.float32)),
        grid_spec=pltpu.PrefetchScalarGridSpec(
            num_scalar_prefetch=0, grid=(B, nt),
            in_specs=[pl.BlockSpec((None, TR, c), lambda b, j: (b, j, 0)),
                      pl.BlockSpec((None, TR, c), lambda b, j: (b, j, 0)),
                      pl.BlockSpec((None, TR, 1), lambda b, j: (b, j, 0))],
            out_specs=[pl.BlockSpec((None, 1, c), lambda b, j: (b, 0, 0)),
                       pl.BlockSpec((None, 1, 1), lambda b, j: (b, 0, 0))],
            scratch_shapes=[pltpu.VMEM((1, c), jnp.float32),
                            pltpu.VMEM((1, 1), jnp.float32)]),
        compiler_params=pltpu.CompilerParams(
            dimension_semantics=("parallel", "arbitrary")),
    )(p, t, m)
    ls = jnp.sum(loss_sum.reshape(B, c), axis=1)
    ms = mask_sum.reshape(B)
    per_b = ls / (c * ms + 0.001)
    return jnp.mean(per_b)


def bce_with_logits_loss(logits, target):
    """Equivalent to F.binary_cross_entropy(sigmoid(logits), target), mean."""
    B = logits.shape[0]
    z = logits.reshape(B, -1).astype(jnp.float32)
    t = target.reshape(B, -1).astype(jnp.float32)
    L = z.shape[1]
    rows = pl.cdiv(L, 128)
    TR, nt = _pick_tile(rows, 8, 1024)
    rows_p = TR * nt
    padn = rows_p * 128 - L
    # pad logits with a large negative value, target 0 -> exactly zero loss
    z3 = jnp.pad(z, ((0, 0), (0, padn)), constant_values=-1e4).reshape(B, rows_p, 128)
    t3 = jnp.pad(t, ((0, 0), (0, padn)), constant_values=0.0).reshape(B, rows_p, 128)
    sums = pl.pallas_call(
        _bce_logits_kernel,
        out_shape=jax.ShapeDtypeStruct((B, 1, 128), jnp.float32),
        grid_spec=pltpu.PrefetchScalarGridSpec(
            num_scalar_prefetch=0, grid=(B, nt),
            in_specs=[pl.BlockSpec((None, TR, 128), lambda b, j: (b, j, 0))] * 2,
            out_specs=pl.BlockSpec((None, 1, 128), lambda b, j: (b, 0, 0)),
            scratch_shapes=[pltpu.VMEM((1, 128), jnp.float32)]),
        compiler_params=pltpu.CompilerParams(
            dimension_semantics=("parallel", "arbitrary")),
    )(z3, t3)
    return jnp.sum(sums) / (B * L)


# ----------------------------------------------------------------------------
# JAX glue: bilinear upsample (align_corners=True, scale 2), kept in bf16
# ----------------------------------------------------------------------------
def upsample2x(x):
    N, H, W, C = x.shape
    dt = x.dtype

    def idx_w(n_in, n_out):
        src = jnp.arange(n_out, dtype=jnp.float32) * ((n_in - 1) / (n_out - 1))
        i0 = jnp.clip(jnp.floor(src).astype(jnp.int32), 0, n_in - 1)
        i1 = jnp.minimum(i0 + 1, n_in - 1)
        w1 = src - i0.astype(jnp.float32)
        return i0, i1, w1.astype(dt), (1.0 - w1).astype(dt)

    i0, i1, wh, whm = idx_w(H, 2 * H)
    x = x[:, i0] * whm[None, :, None, None] + x[:, i1] * wh[None, :, None, None]
    j0, j1, ww, wwm = idx_w(W, 2 * W)
    x = x[:, :, j0] * wwm[None, None, :, None] + x[:, :, j1] * ww[None, None, :, None]
    return x


# ----------------------------------------------------------------------------
# Parameters (deterministic synthetic init, BN folded into scale/bias,
# weights pre-packed (KH*KW, Cin, Cout) bf16 once at build time; no zero pad)
# ----------------------------------------------------------------------------
class KeyGen:
    def __init__(self, seed):
        self.key = jax.random.PRNGKey(seed)

    def __call__(self):
        self.key, sub = jax.random.split(self.key)
        return sub


def _pack_conv(w, scale, bias):
    kh, kw, cin, cout = w.shape
    return dict(w=w.reshape(kh * kw, cin, cout).astype(jnp.bfloat16),
                scale=scale.reshape(1, cout).astype(jnp.float32),
                bias=bias.reshape(1, cout).astype(jnp.float32),
                kh=kh, kw=kw, cin=cin, cout=cout)


def conv_bn(kg, kh, kw, cin, cout):
    w = jax.random.normal(kg(), (kh, kw, cin, cout), jnp.float32) / math.sqrt(kh * kw * cin)
    scale = 1.0 + 0.05 * jax.random.normal(kg(), (cout,), jnp.float32)
    bias = 0.05 * jax.random.normal(kg(), (cout,), jnp.float32)
    return _pack_conv(w, scale, bias)


def conv_bias(kg, kh, kw, cin, cout):
    w = jax.random.normal(kg(), (kh, kw, cin, cout), jnp.float32) / math.sqrt(kh * kw * cin)
    scale = jnp.ones((cout,), jnp.float32)
    bias = 0.01 * jax.random.normal(kg(), (cout,), jnp.float32)
    return _pack_conv(w, scale, bias)


def basic_block_params(kg, cin, cout, downsample):
    p = dict(conv1=conv_bn(kg, 3, 3, cin, cout), conv2=conv_bn(kg, 3, 3, cout, cout))
    if downsample:
        p["down"] = conv_bn(kg, 1, 1, cin, cout)
    return p


def resnet_params(kg, in_ch, fcdim=256):
    return dict(
        conv1=conv_bn(kg, 7, 7, in_ch, 64),
        layer1=[basic_block_params(kg, 64, 64, False), basic_block_params(kg, 64, 64, False)],
        layer2=[basic_block_params(kg, 64, 128, True), basic_block_params(kg, 128, 128, False)],
        layer3=[basic_block_params(kg, 128, 256, True), basic_block_params(kg, 256, 256, False)],
        layer4=[basic_block_params(kg, 256, 512, True), basic_block_params(kg, 512, 512, False)],
        fc=conv_bn(kg, 3, 3, 512, fcdim),
    )


def build_params(seed=0, num_keypoints=8, fcdim=256, s8dim=128, s4dim=64, s2dim=32, raw_dim=32):
    num_edges = num_keypoints * (num_keypoints - 1) // 2
    out_channels = 2 + 1 + num_keypoints * 2 + num_edges * 2
    kg = KeyGen(seed)
    P = {}
    P["rgb"] = resnet_params(kg, 3, fcdim)
    P["dn_backbone"] = resnet_params(kg, 6, fcdim)
    for pre, out_c in (("rgb_", out_channels), ("dn_", 7)):
        P[pre + "conv8s"] = conv_bn(kg, 3, 3, fcdim + 128, s8dim)
        P[pre + "conv4s"] = conv_bn(kg, 3, 3, s8dim + 64, s4dim)
        P[pre + "conv2s"] = conv_bn(kg, 3, 3, s4dim + 64, s2dim)
        P[pre + "convraw1"] = conv_bn(kg, 3, 3, s2dim + 3, raw_dim)
        P[pre + "convraw2"] = conv_bias(kg, 1, 1, raw_dim, out_c)
    P["mfaf"] = conv_bn(kg, 1, 1, 2 * fcdim, 64)          # MFAF stand-in
    P["mfaf_fc1"] = conv_bn(kg, 3, 3, fcdim + 64, 256)
    P["mfaf_fc2"] = conv_bn(kg, 3, 3, 256, 256)
    return P


# ----------------------------------------------------------------------------
# Network forward (glue composing the Pallas kernels)
# ----------------------------------------------------------------------------
def basic_block_fwd(x, p, stride, dilation):
    if "down" in p:
        identity = conv2d(x, p["down"], stride=stride, padding=0, act="none")
    else:
        identity = x
    out = conv2d(x, p["conv1"], stride=stride, dilation=dilation,
                 padding=dilation, act="relu")
    out = conv2d(out, p["conv2"], stride=1, dilation=dilation,
                 padding=dilation, act="relu", residual=identity)
    return out


def layer_fwd(x, blocks, stride, dilation):
    x = basic_block_fwd(x, blocks[0], stride, dilation)
    x = basic_block_fwd(x, blocks[1], 1, dilation)
    return x


def resnet_fwd(x, p):
    # ResNet-18, fully_conv, output_stride=8 (layer3/4 dilated), avg-pool removed.
    x = conv2d(x, p["conv1"], stride=2, padding=3, act="relu")
    x2s = x
    x = maxpool_3x3_s2(x)
    x4s = layer_fwd(x, p["layer1"], 1, 1)
    x8s = layer_fwd(x4s, p["layer2"], 2, 1)
    x16s = layer_fwd(x8s, p["layer3"], 1, 2)
    x32s = layer_fwd(x16s, p["layer4"], 1, 4)
    xfc = conv2d(x32s, p["fc"], stride=1, padding=1, act="relu")
    return x2s, x4s, x8s, x16s, x32s, xfc


def decoder_fwd(xfc, x8s, x4s, x2s, image, P, pre):
    fm = conv2d(jnp.concatenate([xfc, x8s], -1), P[pre + "conv8s"], padding=1, act="leaky")
    fm = upsample2x(fm)
    fm = conv2d(jnp.concatenate([fm, x4s], -1), P[pre + "conv4s"], padding=1, act="leaky")
    fm = upsample2x(fm)
    fm = conv2d(jnp.concatenate([fm, x2s], -1), P[pre + "conv2s"], padding=1, act="leaky")
    fm = upsample2x(fm)
    x = conv2d(jnp.concatenate([fm, image], -1), P[pre + "convraw1"], padding=1, act="leaky")
    x = conv2d(x, P[pre + "convraw2"], padding=0, act="none", out_dtype=jnp.float32)
    return x


def resnet18_8s_forward(P, image, sym_cor, mask, pts2d_map, graph,
                        obj_depth, obj_normal, epoch, num_keypoints=8):
    num_edges = num_keypoints * (num_keypoints - 1) // 2
    to_nhwc = lambda t: jnp.transpose(t, (0, 2, 3, 1)).astype(jnp.float32)
    to_nchw = lambda t: jnp.transpose(t, (0, 3, 1, 2))

    img, msk = to_nhwc(image), to_nhwc(mask)
    sym, pts, gr = to_nhwc(sym_cor), to_nhwc(pts2d_map), to_nhwc(graph)
    dep, nor = to_nhwc(obj_depth), to_nhwc(obj_normal)
    img_b = img.astype(jnp.bfloat16)

    depth_mask = (dep[..., 2:3] != 0.0).astype(jnp.float32) * msk
    normal_mask = (nor[..., 2:3] != 0.0).astype(jnp.float32) * msk

    x2s, x4s, x8s, x16s, x32s, xfc = resnet_fwd(img_b, P["rgb"])

    # depth/normal + mask prediction branch
    x_mask_depth_normal = decoder_fwd(xfc, x8s, x4s, x2s, img_b, P, "dn_")
    mask_logits_dn = x_mask_depth_normal[..., 0:1]
    x_mask_pred = pallas_sigmoid(mask_logits_dn)
    x_mask_pred_onehot = (x_mask_pred > 0.5).astype(jnp.float32)
    x_depth_normal_pred = x_mask_depth_normal[..., 1:]

    if epoch < 200:
        dn_in = jnp.concatenate([dep, nor], -1) * msk
        xfc_dn = resnet_fwd(dn_in, P["dn_backbone"])[5]
    else:
        xfc_dn = resnet_fwd(x_depth_normal_pred * x_mask_pred_onehot, P["dn_backbone"])[5]

    # TODO(synk): MFAF definition unavailable -> 1x1-conv+BN+ReLU fusion stand-in (64 ch).
    mf = conv2d(jnp.concatenate([xfc_dn, xfc], -1), P["mfaf"], padding=0, act="relu")
    xa = conv2d(jnp.concatenate([mf, xfc], -1), P["mfaf_fc1"], padding=1, act="relu")
    xfc_all = conv2d(xa, P["mfaf_fc2"], padding=1, act="relu")

    x_mask_loss = bce_with_logits_loss(mask_logits_dn, msk)
    obj_depth_loss = masked_smooth_l1_loss(x_depth_normal_pred[..., :3], dep, depth_mask)
    obj_normal_loss = masked_smooth_l1_loss(x_depth_normal_pred[..., 3:], nor, normal_mask)

    # keypoint branch
    x = decoder_fwd(xfc_all, x8s, x4s, x2s, img_b, P, "rgb_")
    sym_cor_pred = x[..., :2]
    mask_logits = x[..., 2:3]
    mask_pred = pallas_sigmoid(mask_logits)
    pts2d_map_pred = x[..., 3:-(num_edges * 2)]
    graph_pred = x[..., -(num_edges * 2):]

    graph_loss = masked_smooth_l1_loss(gr, graph_pred, msk)
    sym_cor_loss = masked_smooth_l1_loss(sym_cor_pred, sym, msk)
    mask_loss = bce_with_logits_loss(mask_logits, msk)
    pts2d_loss = masked_smooth_l1_loss(pts2d_map_pred, pts, msk)

    return (to_nchw(sym_cor_pred), to_nchw(mask_pred), to_nchw(pts2d_map_pred),
            to_nchw(graph_pred), sym_cor_loss, mask_loss, pts2d_loss, graph_loss,
            x_mask_loss, obj_depth_loss, obj_normal_loss,
            to_nchw(x_depth_normal_pred[..., :3] * x_mask_pred_onehot),
            to_nchw(x_depth_normal_pred[..., 3:] * x_mask_pred_onehot))


# ----------------------------------------------------------------------------
# Main
# ----------------------------------------------------------------------------
if __name__ == "__main__":
    B, H, W = 2, 16, 16
    num_keypoints = 8
    num_edges = num_keypoints * (num_keypoints - 1) // 2

    key = jax.random.PRNGKey(0)
    ks = jax.random.split(key, 7)
    image = jax.random.normal(ks[0], (B, 3, H, W), jnp.float32)
    sym_cor = jax.random.normal(ks[1], (B, 2, H, W), jnp.float32)
    mask = (jax.random.uniform(ks[2], (B, 1, H, W)) > 0.5).astype(jnp.float32)
    pts2d_map = jax.random.normal(ks[3], (B, num_keypoints * 2, H, W), jnp.float32)
    graph = jax.random.normal(ks[4], (B, num_edges * 2, H, W), jnp.float32)
    obj_depth = jax.random.normal(ks[5], (B, 3, H, W), jnp.float32)
    obj_normal = jax.random.normal(ks[6], (B, 3, H, W), jnp.float32)

    params = build_params(seed=0, num_keypoints=num_keypoints)

    outs = resnet18_8s_forward(params, image, sym_cor, mask, pts2d_map, graph,
                               obj_depth, obj_normal, epoch=0,
                               num_keypoints=num_keypoints)
    jax.block_until_ready(outs)
    print("KERNEL_OK")
</pallas_src>

<mosaic_0001>
module attributes {stable_mosaic.version = 11 : i64} {
  func.func @k(%arg0: i32, %arg1: memref<8x128xf32, #tpu.memory_space<vmem>>, %arg2: memref<8x128xf32, #tpu.memory_space<vmem>>, %arg3: memref<8x128xf32, #tpu.memory_space<vmem>>) attributes {dimension_semantics = [#tpu.dimension_semantics<arbitrary>], iteration_bounds = array<i64: 2>, scalar_prefetch = 0 : i64, scratch_operands = 0 : i64, tpu.core_type = #tpu.core_type<tc>, window_params = [{pipeline_mode = #tpu.pipeline_mode<synchronous>, transform_indices = @transform_0, window_bounds = array<i64: 8, 128>}, {transform_indices = @transform_1, window_bounds = array<i64: 8, 128>}, {transform_indices = @transform_2, window_bounds = array<i64: 8, 128>}]} {
    %c0 = arith.constant 0 : index
    %c0_0 = arith.constant 0 : index
    %0 = vector.load %arg2[%c0, %c0_0] : memref<8x128xf32, #tpu.memory_space<vmem>>, vector<8x128xf32>
    %c0_1 = arith.constant 0 : index
    %c0_2 = arith.constant 0 : index
    %1 = vector.load %arg1[%c0_1, %c0_2] : memref<8x128xf32, #tpu.memory_space<vmem>>, vector<8x128xf32>
    %2 = arith.addf %0, %1 : vector<8x128xf32>
    %c0_3 = arith.constant 0 : index
    %c0_4 = arith.constant 0 : index
    %3 = vector.load %arg3[%c0_3, %c0_4] : memref<8x128xf32, #tpu.memory_space<vmem>>, vector<8x128xf32>
    tpu.vector_store %arg3[%c0_3, %c0_4], %2 {strides = array<i32>} : memref<8x128xf32, #tpu.memory_space<vmem>>, vector<8x128xf32>,
    return
  }
  func.func @transform_0(%arg0: i32) -> (i32, i32) {
    %c0_i32 = arith.constant 0 : i32
    %c0_i32_0 = arith.constant 0 : i32
    %c0_i32_1 = arith.constant 0 : i32
    return %c0_i32, %c0_i32_0 : i32, i32
  }
  func.func @transform_1(%arg0: i32) -> (i32, i32) {
    %c0_i32 = arith.constant 0 : i32
    %c0_i32_0 = arith.constant 0 : i32
    return %arg0, %c0_i32 : i32, i32
  }
  func.func @transform_2(%arg0: i32) -> (i32, i32) {
    %c0_i32 = arith.constant 0 : i32
    %c0_i32_0 = arith.constant 0 : i32
    return %arg0, %c0_i32 : i32, i32
  }
}

module attributes {stable_mosaic.version = 11 : i64} {
  func.func @kernel(%arg0: i32, %arg1: memref<128x147xbf16, #tpu.memory_space<vmem>>, %arg2: memref<147x64xbf16, #tpu.memory_space<vmem>>, %arg3: memref<1x64xf32, #tpu.memory_space<vmem>>, %arg4: memref<1x64xf32, #tpu.memory_space<vmem>>, %arg5: memref<128x64xbf16, #tpu.memory_space<vmem>>) attributes {dimension_semantics = [#tpu.dimension_semantics<parallel>], iteration_bounds = array<i64: 1>, scalar_prefetch = 0 : i64, scratch_operands = 0 : i64, tpu.core_type = #tpu.core_type<tc>, window_params = [{transform_indices = @transform_0, window_bounds = array<i64: 128, 147>}, {pipeline_mode = #tpu.pipeline_mode<synchronous>, transform_indices = @transform_1, window_bounds = array<i64: 147, 64>}, {pipeline_mode = #tpu.pipeline_mode<synchronous>, transform_indices = @transform_2, window_bounds = array<i64: 1, 64>}, {pipeline_mode = #tpu.pipeline_mode<synchronous>, transform_indices = @transform_3, window_bounds = array<i64: 1, 64>}, {transform_indices = @transform_4, window_bounds = array<i64: 128, 64>}]} {
    %c0 = arith.constant 0 : index
    %c0_0 = arith.constant 0 : index
    %0 = vector.load %arg1[%c0, %c0_0] : memref<128x147xbf16, #tpu.memory_space<vmem>>, vector<128x147xbf16>
    %c0_1 = arith.constant 0 : index
    %c0_2 = arith.constant 0 : index
    %1 = vector.load %arg2[%c0_1, %c0_2] : memref<147x64xbf16, #tpu.memory_space<vmem>>, vector<147x64xbf16>
    %cst = arith.constant dense<0.000000e+00> : vector<128x64xf32>
    %2 = tpu.matmul %0, %1, %cst {dimension_numbers = #tpu.dot_dimension_numbers<[1], [0], [0], [1], [0, 0, 1, 1], [], []>} : vector<128x147xbf16>, vector<147x64xbf16>, vector<128x64xf32> -> vector<128x64xf32>
    %c0_3 = arith.constant 0 : index
    %c0_4 = arith.constant 0 : index
    %3 = vector.load %arg3[%c0_3, %c0_4] : memref<1x64xf32, #tpu.memory_space<vmem>>, vector<1x64xf32>
    %4 = vector.broadcast %3 : vector<1x64xf32> to vector<128x64xf32>
    %5 = arith.mulf %2, %4 : vector<128x64xf32>
    %c0_5 = arith.constant 0 : index
    %c0_6 = arith.constant 0 : index
    %6 = vector.load %arg4[%c0_5, %c0_6] : memref<1x64xf32, #tpu.memory_space<vmem>>, vector<1x64xf32>
    %7 = vector.broadcast %6 : vector<1x64xf32> to vector<128x64xf32>
    %8 = arith.addf %5, %7 : vector<128x64xf32>
    %cst_7 = arith.constant 0.000000e+00 : f32
    %9 = vector.broadcast %cst_7 : f32 to vector<128x64xf32>
    %10 = arith.maximumf %8, %9 : vector<128x64xf32>
    %11 = arith.truncf %10 : vector<128x64xf32> to vector<128x64xbf16>
    %c0_8 = arith.constant 0 : index
    %c0_9 = arith.constant 0 : index
    %12 = vector.load %arg5[%c0_8, %c0_9] : memref<128x64xbf16, #tpu.memory_space<vmem>>, vector<128x64xbf16>
    tpu.vector_store %arg5[%c0_8, %c0_9], %11 {strides = array<i32>} : memref<128x64xbf16, #tpu.memory_space<vmem>>, vector<128x64xbf16>,
    return
  }
  func.func @transform_0(%arg0: i32) -> (i32, i32) {
    %c0_i32 = arith.constant 0 : i32
    %c0_i32_0 = arith.constant 0 : i32
    return %arg0, %c0_i32 : i32, i32
  }
  func.func @transform_1(%arg0: i32) -> (i32, i32) {
    %c0_i32 = arith.constant 0 : i32
    %c0_i32_0 = arith.constant 0 : i32
    %c0_i32_1 = arith.constant 0 : i32
    return %c0_i32, %c0_i32_0 : i32, i32
  }
  func.func @transform_2(%arg0: i32) -> (i32, i32) {
    %c0_i32 = arith.constant 0 : i32
    %c0_i32_0 = arith.constant 0 : i32
    %c0_i32_1 = arith.constant 0 : i32
    return %c0_i32, %c0_i32_0 : i32, i32
  }
  func.func @transform_3(%arg0: i32) -> (i32, i32) {
    %c0_i32 = arith.constant 0 : i32
    %c0_i32_0 = arith.constant 0 : i32
    %c0_i32_1 = arith.constant 0 : i32
    return %c0_i32, %c0_i32_0 : i32, i32
  }
  func.func @transform_4(%arg0: i32) -> (i32, i32) {
    %c0_i32 = arith.constant 0 : i32
    %c0_i32_0 = arith.constant 0 : i32
    return %arg0, %c0_i32 : i32, i32
  }
}

</mosaic_0001>

<bundles_post_ra>
// kernel: tpu_custom_call.1
= control target key start
LH: loop header
LB: loop body
LE: loop exit
PB: predicated region body
PF: predicated region fallthrough
CT: control target
= control target key end

     0   :  { %7 = vsyncpa [#allocation3], 0  ;;  %s692_s0 = inlined_call_operand.hbm [shape: f32[8,128], index: 0, kind: input, shape index: {}]   ;;  %s693_s1 = inlined_call_operand.hbm [shape: f32[16,128], index: 1, kind: input, shape index: {}]   ;;  %s694_s2 = inlined_call_operand.hbm [shape: f32[16,128], index: 2, kind: output, shape index: {}]  }
   0x1   :  { %8 = vsyncpa [#allocation6], 0 }
   0x2   :  { %10 = vsyncpa [#allocation6 + $0x1], 0 }
   0x3   :  { %11 = vsyncpa [#allocation4], 0 }
   0x4   :  { %13 = vsyncpa [#allocation4 + $0x1], 0  ;;  %s491_s9 = smov 0   ;;  %s493_s10 = smov 0  }
   0x5   :  { %s495_s11 = smov 0   ;;  %s497_s12 = smov 0  }
   0x6 LB: > { %s512_s13 = sadd.s32 4294967295, %s471_s12   ;;  %s272_s14 = sadd.s32 4294967294, %s471_s12   ;;  %s471_s12 = sphi %s497_s12, %s718_s12   ;;  %s467_s11 = sphi %s495_s11, %s717_s11   ;;  %s463_s10 = sphi %s493_s10, %s716_s10   ;;  %s459_s9 = sphi %s491_s9, %s715_s9  }
   0x7   : > { %p60_p0 = scmp.ne.s32.totalorder %s463_s10, %s459_s9  ;;  %p695_p1 = scmp.eq.s32.totalorder %s512_s13, 0 }
   0x8   : > { %p90_p3 = scmp.eq.s32.totalorder %s272_s14, 1  ;;  %p273_p5 = scmp.ge.s32.totalorder %s471_s12, 1 }
   0x9   : > { %p521_p4 = por %p695_p1, %p60_p0  ;;  %p97_p7 = scmp.lt.s32.totalorder %s471_s12, 3 }
   0xa   : > { %p526_p6 = por %p90_p3, %p60_p0  ;;  %s473_s18 = smov [#allocation2]  }
   0xb   : > { %s698_s15 = scalar_select %p521_p4, 1, 0 }
   0xc   : > { %s699_s16 = scalar_select %p526_p6, 1, 0 }
   0xd   : > { %p531_p8 = pnand %p273_p5, %p97_p7  ;;  %s110_s19 = sshll.u32 %s473_s18, 4  ;;  %s111_s19 = int_to_ptr.vmem [resolvable:$true] %s110_s19 }
   0xe   : > { %s539_s20 = sadd.s32 1, %s471_s12   ;;  %s47_s24 = sadd.s32 1, %s467_s11 }
   0xf   : > { %s700_s17 = scalar_select %p531_p8, 1, 0 }
  0x10   : > { %p294_p10 = pneg %p531_p8  ;;  %s44_s22 = ssub.s32 %s471_s12, %s539_s20 }
  0x11   : > { %p549_p12 = scmp.eq.s32.totalorder %s44_s22, 0  ;;  %s343_s27 = scalar_lea.hbm %s692_s0, 128 }
  0x12   : > { %p543_p11 = pnand %p294_p10, %p695_p1  ;;  %p344_p0 = scmp.ne.s32.totalorder %s692_s0, %s343_s27 }
  0x13   : > { %s702_s23 = scalar_select %p549_p12, 1, 0 }
  0x14   : > { %p345_p3 = pneg %p543_p11  ;;  %p350_p10 = scmp.lt.u32.totalorder %s343_s27, %s692_s0 }
  0x16   : > { %p346_p5 = pnand %p345_p3, %p344_p0 }
  0x18   : > { %p347_p7 = pneg %p346_p5 }
  0x1a   : > { %p352_p9 = pnand %p350_p10, %p347_p7 }
  0x1c   : > { %355 = shalt.err (!%p352_p9)
}
  0x1d   : > { %s356_s4 = scalar_lea.vmem %s111_s19, 128  ;;  %p364_p6 = scmp.lt.s32.totalorder %s111_s19, %s111_s19 }
  0x1e   : > { %p357_p1 = scmp.ne.s32.totalorder %s111_s19, %s356_s4  ;;  %p365_p4 = scmp.lt.s32.totalorder %s356_s4, %s356_s4 }
  0x20   : > { %p359_p2 = pnand %p357_p1, %p345_p3  ;;  %p366_p8 = por %p365_p4, %p364_p6 }
  0x22   : > { %p360_p13 = pneg %p359_p2 }
  0x24   : > { %p367_p12 = pnand %p366_p8, %p360_p13 }
  0x26   : > { %370 = shalt.err (!%p367_p12)
}
  0x27   : > { %297 = dma.hbm_to_vmem [thread:$0]  (!%p543_p11), %s692_s0, 128, %s111_s19, [#allocation3]  }
  0x28   : > { %p703_p1 = scmp.ne.s32.totalorder %s702_s23, 0  ;;  %p55_p2 = scmp.eq.s32.totalorder %s471_s12, 0 }
  0x29   : > { %p704_p4 = scmp.ne.s32.totalorder %s467_s11, %s463_s10  ;;  %p705_p6 = scmp.eq.s32.totalorder %s512_s13, 1 }
  0x2a   : > { %s575_s7 = scalar_select %p703_p1, %s467_s11, %s47_s24  }
  0x2b   : > { %p583_p8 = por %p705_p6, %p704_p4  ;;  %p307_p9 = scmp.lt.s32.totalorder %s471_s12, 2 }
  0x2c   : > { %s121_s14 = sand.u32 1, %s467_s11   ;;  %p707_p12 = pmov %p704_p4 }
  0x2d   : > { %s276_s18 = sshll.u32 %s121_s14, 3  ;;  %s277_s21 = sshll.u32 %s471_s12, 7 }
  0x2e   : > { %p56_p13 = por %p55_p2, %p707_p12  ;;  %s596_s19 = scalar_lea.hbm %s693_s1, %s277_s21 }
  0x2f   : > { %s125_s23 = scalar_lea.vmem [#allocation5], %s276_s18  ;;  %s122_s27 = scalar_lea.sflag [#allocation6], %s121_s14 }
  0x30   : > { %s132_s24 = sshll.u32 %s125_s23, 4  ;;  %p598_p11 = pnand %p307_p9, %p56_p13  ;;  %s602_s24 = int_to_ptr.vmem [resolvable:$true] %s132_s24 }
  0x31   : > { %s371_s28 = scalar_lea.hbm %s596_s19, 128  ;;  %s376_s3 = scalar_lea.hbm %s693_s1, 256 }
  0x32   : > { %p372_p0 = scmp.ne.s32.totalorder %s596_s19, %s371_s28  ;;  %p373_p3 = pneg %p598_p11 }
  0x33   : > { %p377_p10 = scmp.lt.u32.totalorder %s596_s19, %s693_s1  ;;  %p378_p1 = scmp.lt.u32.totalorder %s376_s3, %s371_s28 }
  0x34   : > { %p374_p5 = pnand %p373_p3, %p372_p0  ;;  %p380_p4 = scmp.lt.u32.totalorder %s371_s28, %s596_s19 }
  0x35   : > { %p379_p2 = por %p378_p1, %p377_p10 }
  0x36   : > { %p375_p7 = pneg %p374_p5 }
  0x37   : > { %p381_p6 = por %p380_p4, %p379_p2 }
  0x39   : > { %p382_p9 = pnand %p381_p6, %p375_p7 }
  0x3b   : > { %385 = shalt.err (!%p382_p9)
}
  0x3c   : > { %s386_s6 = scalar_lea.vmem %s602_s24, 128  ;;  %s474_s14 = smov [#allocation5]  }
  0x3d   : > { %p387_p12 = scmp.ne.s32.totalorder %s602_s24, %s386_s6  ;;  %s391_s18 = sshll.u32 %s474_s14, 4  ;;  %s392_s18 = int_to_ptr.vmem [resolvable:$false] %s391_s18 }
  0x3e   : > { %s393_s21 = scalar_lea.vmem %s392_s18, 256  ;;  %p394_p5 = scmp.lt.s32.totalorder %s602_s24, %s392_s18 }
  0x3f   : > { %p389_p13 = pnand %p387_p12, %p373_p3  ;;  %p395_p10 = scmp.lt.s32.totalorder %s393_s21, %s386_s6 }
  0x41   : > { %p390_p0 = pneg %p389_p13  ;;  %p396_p1 = por %p395_p10, %p394_p5 }
  0x43   : > { %p397_p2 = pnand %p396_p1, %p390_p0 }
  0x45   : > { %400 = shalt.err (!%p397_p2)
}
  0x46   : > { %301 = dma.hbm_to_vmem [thread:$0]  (!%p598_p11), %s596_s19, 128, %s602_s24, %s122_s27  }
  0x47   : > { %p709_p7 = scmp.ne.s32.totalorder %s700_s17, 0 }
  0x48   : > { %p710_p3 = scmp.eq.s32.totalorder (!%p709_p7), %s512_s13, 0 }
  0x49   : > { %141 = sbr.rel (%p709_p7) target bundleno = 110 (0x6e), region = 28 }
  0x50   : > { %446 = dma.done.wait (%p710_p3), [#allocation3], 128   ;;  %p711_p4 = pmov %p710_p3 }
  0x51   : > { %s636_s22 = sand.u32 1, %s463_s10   ;;  %p712_p6 = scmp.ne.s32.totalorder %s698_s15, 0 }
  0x52   : > { %448 = vsyncadd (%p711_p4), [#allocation3], 4294967168  ;;  %s280_s25 = sshll.u32 %s636_s22, 3  ;;  %s148_s23 = scalar_lea.sflag [#allocation6], %s636_s22 }
  0x53   : > { %s151_s26 = scalar_lea.vmem [#allocation5], %s280_s25 }
  0x54   : > { %450 = dma.done.wait (%p712_p6), %s148_s23, 128  }
  0x55   : > { %452 = vsyncadd (%p712_p6), %s148_s23, 4294967168  ;;  %s171_s17 = scalar_lea.vmem [#allocation7], %s280_s25  ;;  %s283_s24 = sshll.u32 %s512_s13, 7  ;;  %v172_v0 = vld [vmem:[%s151_s26] sm:$0xff]  ;;  %v173_v1 = vld [vmem:[#allocation2] sm:$0xff] }
  0x56   : > { %s190_s19 = sshll.u32 %s171_s17, 4  ;;  %v174_v2 = vadd.f32 %v173_v1, %v172_v0  ;;  %s650_s29 = scalar_lea.hbm %s694_s2, %s283_s24  ;;  %s645_s19 = int_to_ptr.vmem [resolvable:$true] %s190_s19 }
  0x57   : > { %s177_s15 = scalar_lea.sflag [#allocation4], %s636_s22  ;;  %s401_s30 = scalar_lea.vmem %s645_s19, 128 }
  0x58   : > { %175 = vst [vmem:[%s171_s17] sm:$0xff] %v174_v2  ;;  %p402_p11 = scmp.ne.s32.totalorder %s645_s19, %s401_s30  ;;  %s475_s13 = smov [#allocation7]  }
  0x59   : > { %s405_s3 = sshll.u32 %s475_s13, 4  ;;  %s406_s3 = int_to_ptr.vmem [resolvable:$false] %s405_s3 }
  0x5a   : > { %p403_p9 = pnand %p402_p11, %p583_p8  ;;  %s407_s4 = scalar_lea.vmem %s406_s3, 256 }
  0x5b   : > { %p408_p13 = scmp.lt.s32.totalorder %s645_s19, %s406_s3  ;;  %p409_p0 = scmp.lt.s32.totalorder %s407_s4, %s401_s30 }
  0x5c   : > { %p404_p12 = pneg %p403_p9 }
  0x5d   : > { %p410_p5 = por %p409_p0, %p408_p13 }
  0x5f   : > { %p411_p10 = pnand %p410_p5, %p404_p12 }
  0x61   : > { %414 = shalt.err (!%p411_p10)
}
  0x62   : > { %s415_s5 = scalar_lea.hbm %s650_s29, 128  ;;  %s419_s18 = scalar_lea.hbm %s694_s2, 256 }
  0x63   : > { %p416_p1 = scmp.ne.s32.totalorder %s650_s29, %s415_s5  ;;  %p420_p3 = scmp.lt.u32.totalorder %s650_s29, %s694_s2 }
  0x64   : > { %p421_p4 = scmp.lt.u32.totalorder %s419_s18, %s415_s5  ;;  %p423_p11 = scmp.lt.u32.totalorder %s415_s5, %s650_s29 }
  0x65   : > { %p417_p2 = pnand %p416_p1, %p583_p8 }
  0x66   : > { %p422_p6 = por %p421_p4, %p420_p3 }
  0x67   : > { %p418_p7 = pneg %p417_p2 }
  0x68   : > { %p424_p9 = por %p423_p11, %p422_p6 }
  0x6a   : > { %p425_p12 = pnand %p424_p9, %p418_p7 }
  0x6c   : > { %428 = shalt.err (!%p425_p12)
}
  0x6d   : > { %292 = dma.vmem_to_hbm [thread:$0]  (%p583_p8), %s645_s19, 128, %s650_s29, %s177_s15  }
  0x6e PF: > { %s202_s25 = sand.u32 1, %s459_s9   ;;  %p713_p13 = scmp.ne.s32.totalorder %s699_s16, 0 }
  0x6f   : > { %p714_p0 = scmp.ge.s32.totalorder %s471_s12, 2  ;;  %s203_s23 = scalar_lea.sflag [#allocation4], %s202_s25 }
  0x71   : > { %p303_p5 = pnand %p714_p0, %p713_p13 }
  0x73   : > { %454 = dma.done.wait (!%p303_p5), %s203_s23, 128  }
  0x74   : > { %456 = vsyncadd (!%p303_p5), %s203_s23, 4294967168  ;;  %p16_p10 = scmp.ge.s32.totalorder %s539_s20, 4   ;;  %s715_s9 = smov %s463_s10 }
  0x75   : > { %s716_s10 = smov %s467_s11  ;;  %s717_s11 = smov %s575_s7 }
  0x76   : > { %s718_s12 = smov %s539_s20  ;;  %18 = sbr.rel (!%p16_p10) target bundleno = 6 (0x6), region = 78 }
  0x7d   :  { %208 = vsyncpa [#allocation3], 1 }
  0x7e   :  { %210 = vsyncpa [#allocation3 + $0x1], 1 }
  0x7f   :  { %211 = vsyncpa [#allocation6], 1 }
  0x80   :  { %213 = vsyncpa [#allocation6 + $0x1], 1 }
  0x81   :  { %214 = vsyncpa [#allocation4], 1 }
  0x82   :  { %216 = vsyncpa [#allocation4 + $0x1], 1 }

// kernel: tpu_custom_call.1
= control target key start
LH: loop header
LB: loop body
LE: loop exit
PB: predicated region body
PF: predicated region fallthrough
CT: control target
= control target key end

     0   :  { %v582_v0 = vmov 0   ;;  %vm182_vm0 = vcmask 154624   ;;  %vm207_vm1 = vcmask 1040384   ;;  %vm208_vm2 = vcmask 1041408   ;;  %s801_s1 = inlined_call_operand.vmem [shape: bf16[147,64], index: 1, kind: input, shape index: {}]   ;;  %s802_s0 = inlined_call_operand.vmem [shape: bf16[128,147], index: 0, kind: input, shape index: {}]   ;;  %s803_s2 = inlined_call_operand.vmem [shape: f32[1,64], index: 2, kind: input, shape index: {}]   ;;  %s804_s3 = inlined_call_operand.vmem [shape: f32[1,64], index: 3, kind: input, shape index: {}]   ;;  %s805_s4 = inlined_call_operand.vmem [shape: bf16[128,64], index: 4, kind: output, shape index: {}]  }
   0x1   :  { %214 = vmatprep.subr.bf16.mxu0 %v582_v0  ;;  %526 = vmatprep.subr.bf16.mxu1 %v582_v0  ;;  %v548_v1 = vld [vmem:[%s801_s1] sm:$0xff]   ;;  %v549_v2 = vld [vmem:[%s801_s1 + $0x8] sm:$0xff]   ;;  %v550_v3 = vld [vmem:[%s801_s1 + $0x10] sm:$0xff]   ;;  %v583_v11 = vmov 65535   ;;  %vm437_vm3 = vcmask 519168  }
   0x2   :  { %215 = vmatpush1.bf16.msra.mxu0 %v548_v1  ;;  %536 = vmatpush1.bf16.msra.mxu1 %v548_v1  ;;  %v551_v4 = vld [vmem:[%s801_s1 + $0x18] sm:$0xff]   ;;  %v560_v5 = vld [vmem:[%s802_s0 + $0x4] ss:$8 sps:$4 sm:$0xff]   ;;  %v554_v9 = vld [vmem:[%s801_s1 + $0x30] sm:$0xff]   ;;  %v209_v12 = vsel %vm207_vm1, 4294967295, %v583_v11 }
   0x3   :  { %216 = vmatprep.subr.bf16.mxu0 %v582_v0  ;;  %527 = vmatprep.subr.bf16.mxu1 %v582_v0  ;;  %v563_v6 = vld [vmem:[%s802_s0 + $0x44] ss:$8 sps:$4 sm:$0xff]   ;;  %v555_v10 = vld [vmem:[%s801_s1 + $0x38] sm:$0xff]   ;;  %v557_v14 = vld [vmem:[%s801_s1 + $0x48] ss:$0 sps:$4 sm:$0x33]  }
   0x4   :  { %484 = vmatprep.mubr.msk.bf16.mxu0 %vm182_vm0, %v560_v5  ;;  %v552_v7 = vld [vmem:[%s801_s1 + $0x20] sm:$0xff]   ;;  %488 = vmatprep.mubr.msk.bf16.mxu1 %vm182_vm0, %v563_v6  ;;  %v553_v8 = vld [vmem:[%s801_s1 + $0x28] sm:$0xff]   ;;  %v210_v15 = vsel %vm208_vm2, %v209_v12, 0  ;;  %v564_v19 = vld [vmem:[%s802_s0 + $0x14] ss:$8 sps:$4 sm:$0xff]  }
   0x5   :  { %v556_v13 = vld [vmem:[%s801_s1 + $0x40] sm:$0xff]   ;;  %v212_v16 = vand.u32 %v557_v14, %v210_v15  ;;  %v566_v20 = vld [vmem:[%s802_s0 + $0x54] ss:$8 sps:$4 sm:$0xff]   ;;  %v568_v21 = vld [vmem:[%s802_s0 + $0x10] ss:$8 sps:$4 sm:$0xff]  }
   0x6   :  { %217 = vmatpush1.bf16.msra.mxu0 %v549_v2  ;;  %537 = vmatpush1.bf16.msra.mxu1 %v549_v2  ;;  %v558_v17 = vld [vmem:[%s802_s0] ss:$8 sps:$4 sm:$0xff]   ;;  %v569_v22 = vld [vmem:[%s802_s0 + $0x50] ss:$8 sps:$4 sm:$0xff]   ;;  %v570_v23 = vld [vmem:[%s802_s0 + $0x24] ss:$8 sps:$4 sm:$0xff]  }
   0x7   :  { %218 = vmatprep.subr.bf16.mxu0 %v582_v0  ;;  %528 = vmatprep.subr.bf16.mxu1 %v582_v0  ;;  %v561_v18 = vld [vmem:[%s802_s0 + $0x40] ss:$8 sps:$4 sm:$0xff]   ;;  %v572_v24 = vld [vmem:[%s802_s0 + $0x64] ss:$8 sps:$4 sm:$0xff]   ;;  %v576_v27 = vld [vmem:[%s802_s0 + $0x34] ss:$8 sps:$4 sm:$0xff]  }
   0x8   :  { %v574_v25 = vld [vmem:[%s802_s0 + $0x20] ss:$8 sps:$4 sm:$0xff]   ;;  %v578_v28 = vld [vmem:[%s802_s0 + $0x74] ss:$8 sps:$4 sm:$0xff]   ;;  %v580_v29 = vld [vmem:[%s802_s0 + $0x30] ss:$8 sps:$4 sm:$0xff]  }
   0x9   :  { %v575_v26 = vld [vmem:[%s802_s0 + $0x60] ss:$8 sps:$4 sm:$0xff]   ;;  %v581_v30 = vld [vmem:[%s802_s0 + $0x70] ss:$8 sps:$4 sm:$0xff]  }
   0xa   :  { %219 = vmatpush1.bf16.msra.mxu0 %v550_v3  ;;  %538 = vmatpush1.bf16.msra.mxu1 %v550_v3  ;;  %v698_v31 = vld [vmem:[%s803_s2] ss:$0 sm:$0xff] }
   0xb   :  { %220 = vmatprep.subr.bf16.mxu0 %v582_v0  ;;  %529 = vmatprep.subr.bf16.mxu1 %v582_v0  ;;  %v703_v33 = vld [vmem:[%s804_s3] ss:$0 sm:$0xff] }
   0xe   :  { %221 = vmatpush1.bf16.msra.mxu0 %v551_v4  ;;  %539 = vmatpush1.bf16.msra.mxu1 %v551_v4 }
   0xf   :  { %222 = vmatprep.subr.bf16.mxu0 %v582_v0  ;;  %530 = vmatprep.subr.bf16.mxu1 %v582_v0 }
  0x12   :  { %223 = vmatpush1.bf16.msra.mxu0 %v552_v7  ;;  %540 = vmatpush1.bf16.msra.mxu1 %v552_v7 }
  0x13   :  { %224 = vmatprep.subr.bf16.mxu0 %v582_v0  ;;  %531 = vmatprep.subr.bf16.mxu1 %v582_v0 }
  0x16   :  { %225 = vmatpush1.bf16.msra.mxu0 %v553_v8  ;;  %541 = vmatpush1.bf16.msra.mxu1 %v553_v8 }
  0x17   :  { %226 = vmatprep.subr.bf16.mxu0 %v582_v0  ;;  %532 = vmatprep.subr.bf16.mxu1 %v582_v0 }
  0x1a   :  { %227 = vmatpush1.bf16.msra.mxu0 %v554_v9  ;;  %542 = vmatpush1.bf16.msra.mxu1 %v554_v9 }
  0x1b   :  { %228 = vmatprep.subr.bf16.mxu0 %v582_v0  ;;  %533 = vmatprep.subr.bf16.mxu1 %v582_v0 }
  0x1e   :  { %229 = vmatpush1.bf16.msra.mxu0 %v555_v10  ;;  %543 = vmatpush1.bf16.msra.mxu1 %v555_v10 }
  0x1f   :  { %230 = vmatprep.subr.bf16.mxu0 %v582_v0  ;;  %534 = vmatprep.subr.bf16.mxu1 %v582_v0 }
  0x22   :  { %231 = vmatpush1.bf16.msra.mxu0 %v556_v13  ;;  %544 = vmatpush1.bf16.msra.mxu1 %v556_v13 }
  0x23   :  { %232 = vmatprep.subr.bf16.mxu0 %v582_v0  ;;  %535 = vmatprep.subr.bf16.mxu1 %v582_v0 }
  0x26   :  { %233 = vmatpush1.bf16.msra.mxu0 %v212_v16  ;;  %545 = vmatpush1.bf16.msra.mxu1 %v212_v16 }
  0x29   :  { %247 = vmatmul.mubr.bf16.vlgmr.msra.gmra.mrb[0].mxu0 %v558_v17  ;;  %279 = vmatmul.mubr.bf16.vlgmr.msra.gmra.mrb[0].mxu1 %v561_v18 }
  0x2a   :  { %485 = vmatprep.mubr.msk.bf16.mxu0 %vm182_vm0, %v564_v19  ;;  %489 = vmatprep.mubr.msk.bf16.mxu1 %vm182_vm0, %v566_v20 }
  0x31   :  { %255 = vmatmul.mubr.bf16.gmra.mrb[4].mxu0 %v568_v21  ;;  %287 = vmatmul.mubr.bf16.gmra.mrb[4].mxu1 %v569_v22 }
  0x32   :  { %486 = vmatprep.mubr.msk.bf16.mxu0 %vm182_vm0, %v570_v23  ;;  %490 = vmatprep.mubr.msk.bf16.mxu1 %vm182_vm0, %v572_v24 }
  0x39   :  { %263 = vmatmul.mubr.bf16.gmra.mrb[8].mxu0 %v574_v25  ;;  %295 = vmatmul.mubr.bf16.gmra.mrb[8].mxu1 %v575_v26 }
  0x3a   :  { %487 = vmatprep.mubr.msk.bf16.mxu0 %vm182_vm0, %v576_v27  ;;  %491 = vmatprep.mubr.msk.bf16.mxu1 %vm182_vm0, %v578_v28 }
  0x41   :  { %271 = vmatmul.mubr.bf16.gmra.mrb[12].mxu0 %v580_v29  ;;  %303 = vmatmul.mubr.bf16.gmra.mrb[12].mxu1 %v581_v30 }
  0xfc   :  { %v248_v32 = vpop.f32.mrb[0].mxu0  ;;  %v280_v34 = vpop.f32.mrb[0].mxu1 }
  0xfd   :  { %v318_v35 = vmul.f32 %v698_v31, %v248_v32  ;;  %v326_v36 = vmul.f32 %v698_v31, %v280_v34  ;;  %v250_v37 = vpop.f32.mrb[1].mxu0  ;;  %v282_v38 = vpop.f32.mrb[1].mxu1 }
  0xfe   :  { %v251_v39 = vpop.f32.mrb[2].mxu0  ;;  %v283_v40 = vpop.f32.mrb[2].mxu1 }
  0xff   :  { %v341_v41 = vadd.f32 %v703_v33, %v318_v35  ;;  %v349_v42 = vadd.f32 %v703_v33, %v326_v36  ;;  %v319_v43 = vmul.f32 %v698_v31, %v251_v39  ;;  %v327_v44 = vmul.f32 %v698_v31, %v283_v40  ;;  %v253_v45 = vpop.f32.mrb[3].mxu0  ;;  %v285_v46 = vpop.f32.mrb[3].mxu1 }
 0x101   :  { %v357_v47 = vmax.f32 %v341_v41, 0.0  ;;  %v365_v48 = vmax.f32 %v349_v42, 0.0  ;;  %v342_v49 = vadd.f32 %v703_v33, %v319_v43  ;;  %v350_v50 = vadd.f32 %v703_v33, %v327_v44 }
 0x103   :  { %v510_v51 = vpack.c.bf16 %v357_v47, %v357_v47  ;;  %v518_v52 = vpack.c.bf16 %v365_v48, %v365_v48  ;;  %v358_v53 = vmax.f32 %v342_v49, 0.0  ;;  %v366_v54 = vmax.f32 %v350_v50, 0.0 }
 0x104   :  { %v256_v55 = vpop.f32.mrb[4].mxu0  ;;  %v288_v56 = vpop.f32.mrb[4].mxu1 }
 0x105   :  { %438 = vst.msk [vmem:[%s805_s4] sm:$0xf] %vm437_vm3, %v510_v51  ;;  %446 = vst.msk [vmem:[%s805_s4 + $0x20] sm:$0xf] %vm437_vm3, %v518_v52  ;;  %v511_v57 = vpack.c.bf16 %v358_v53, %v358_v53  ;;  %v519_v58 = vpack.c.bf16 %v366_v54, %v366_v54  ;;  %v320_v59 = vmul.f32 %v698_v31, %v256_v55  ;;  %v258_v61 = vpop.f32.mrb[5].mxu0  ;;  %v290_v62 = vpop.f32.mrb[5].mxu1 }
 0x106   :  { %v328_v60 = vmul.f32 %v698_v31, %v288_v56  ;;  %v259_v63 = vpop.f32.mrb[6].mxu0  ;;  %v291_v0 = vpop.f32.mrb[6].mxu1 }
 0x107   :  { %439 = vst.msk [vmem:[%s805_s4 + $0x4] sm:$0xf] %vm437_vm3, %v511_v57  ;;  %447 = vst.msk [vmem:[%s805_s4 + $0x24] sm:$0xf] %vm437_vm3, %v519_v58  ;;  %v343_v1 = vadd.f32 %v703_v33, %v320_v59  ;;  %v321_v3 = vmul.f32 %v698_v31, %v259_v63  ;;  %v329_v4 = vmul.f32 %v698_v31, %v291_v0  ;;  %v261_v5 = vpop.f32.mrb[7].mxu0  ;;  %v293_v6 = vpop.f32.mrb[7].mxu1 }
 0x108   :  { %v351_v2 = vadd.f32 %v703_v33, %v328_v60 }
 0x109   :  { %v359_v7 = vmax.f32 %v343_v1, 0.0  ;;  %v344_v9 = vadd.f32 %v703_v33, %v321_v3  ;;  %v352_v10 = vadd.f32 %v703_v33, %v329_v4 }
 0x10a   :  { %v367_v8 = vmax.f32 %v351_v2, 0.0 }
 0x10b   :  { %v512_v11 = vpack.c.bf16 %v359_v7, %v359_v7  ;;  %v360_v13 = vmax.f32 %v344_v9, 0.0  ;;  %v368_v14 = vmax.f32 %v352_v10, 0.0 }
 0x10c   :  { %v520_v12 = vpack.c.bf16 %v367_v8, %v367_v8  ;;  %v264_v15 = vpop.f32.mrb[8].mxu0  ;;  %v296_v16 = vpop.f32.mrb[8].mxu1 }
 0x10d   :  { %440 = vst.msk [vmem:[%s805_s4 + $0x8] sm:$0xf] %vm437_vm3, %v512_v11  ;;  %v513_v17 = vpack.c.bf16 %v360_v13, %v360_v13  ;;  %v521_v18 = vpack.c.bf16 %v368_v14, %v368_v14  ;;  %v322_v19 = vmul.f32 %v698_v31, %v264_v15  ;;  %v330_v20 = vmul.f32 %v698_v31, %v296_v16  ;;  %v266_v21 = vpop.f32.mrb[9].mxu0  ;;  %v298_v22 = vpop.f32.mrb[9].mxu1 }
 0x10e   :  { %448 = vst.msk [vmem:[%s805_s4 + $0x28] sm:$0xf] %vm437_vm3, %v520_v12  ;;  %v267_v23 = vpop.f32.mrb[10].mxu0  ;;  %v299_v24 = vpop.f32.mrb[10].mxu1 }
 0x10f   :  { %441 = vst.msk [vmem:[%s805_s4 + $0xc] sm:$0xf] %vm437_vm3, %v513_v17  ;;  %449 = vst.msk [vmem:[%s805_s4 + $0x2c] sm:$0xf] %vm437_vm3, %v521_v18  ;;  %v345_v25 = vadd.f32 %v703_v33, %v322_v19  ;;  %v353_v26 = vadd.f32 %v703_v33, %v330_v20  ;;  %v323_v27 = vmul.f32 %v698_v31, %v267_v23  ;;  %v269_v29 = vpop.f32.mrb[11].mxu0  ;;  %v301_v30 = vpop.f32.mrb[11].mxu1 }
 0x110   :  { %v331_v28 = vmul.f32 %v698_v31, %v299_v24 }
 0x111   :  { %v361_v32 = vmax.f32 %v345_v25, 0.0  ;;  %v369_v34 = vmax.f32 %v353_v26, 0.0  ;;  %v346_v35 = vadd.f32 %v703_v33, %v323_v27 }
 0x112   :  { %v354_v36 = vadd.f32 %v703_v33, %v331_v28 }
 0x113   :  { %v514_v37 = vpack.c.bf16 %v361_v32, %v361_v32  ;;  %v522_v38 = vpack.c.bf16 %v369_v34, %v369_v34  ;;  %v362_v39 = vmax.f32 %v346_v35, 0.0 }
 0x114   :  { %v370_v40 = vmax.f32 %v354_v36, 0.0  ;;  %v272_v41 = vpop.f32.mrb[12].mxu0  ;;  %v304_v42 = vpop.f32.mrb[12].mxu1 }
 0x115   :  { %442 = vst.msk [vmem:[%s805_s4 + $0x10] sm:$0xf] %vm437_vm3, %v514_v37  ;;  %450 = vst.msk [vmem:[%s805_s4 + $0x30] sm:$0xf] %vm437_vm3, %v522_v38  ;;  %v515_v43 = vpack.c.bf16 %v362_v39, %v362_v39  ;;  %v324_v45 = vmul.f32 %v698_v31, %v272_v41  ;;  %v332_v46 = vmul.f32 %v698_v31, %v304_v42  ;;  %v274_v47 = vpop.f32.mrb[13].mxu0  ;;  %v306_v48 = vpop.f32.mrb[13].mxu1 }
 0x116   :  { %v523_v44 = vpack.c.bf16 %v370_v40, %v370_v40  ;;  %v275_v49 = vpop.f32.mrb[14].mxu0  ;;  %v307_v50 = vpop.f32.mrb[14].mxu1 }
 0x117   :  { %443 = vst.msk [vmem:[%s805_s4 + $0x14] sm:$0xf] %vm437_vm3, %v515_v43  ;;  %v347_v51 = vadd.f32 %v703_v33, %v324_v45  ;;  %v355_v52 = vadd.f32 %v703_v33, %v332_v46  ;;  %v325_v53 = vmul.f32 %v698_v31, %v275_v49  ;;  %v333_v54 = vmul.f32 %v698_v31, %v307_v50  ;;  %v277_v55 = vpop.f32.mrb[15].mxu0  ;;  %v309_v56 = vpop.f32.mrb[15].mxu1 }
 0x118   :  { %451 = vst.msk [vmem:[%s805_s4 + $0x34] sm:$0xf] %vm437_vm3, %v523_v44 }
 0x119   :  { %v363_v57 = vmax.f32 %v347_v51, 0.0  ;;  %v371_v58 = vmax.f32 %v355_v52, 0.0  ;;  %v348_v59 = vadd.f32 %v703_v33, %v325_v53  ;;  %v356_v60 = vadd.f32 %v703_v33, %v333_v54 }
 0x11b   :  { %v516_v61 = vpack.c.bf16 %v363_v57, %v363_v57  ;;  %v524_v62 = vpack.c.bf16 %v371_v58, %v371_v58  ;;  %v364_v63 = vmax.f32 %v348_v59, 0.0  ;;  %v372_v0 = vmax.f32 %v356_v60, 0.0 }
 0x11d   :  { %444 = vst.msk [vmem:[%s805_s4 + $0x18] sm:$0xf] %vm437_vm3, %v516_v61  ;;  %452 = vst.msk [vmem:[%s805_s4 + $0x38] sm:$0xf] %vm437_vm3, %v524_v62  ;;  %v517_v31 = vpack.c.bf16 %v364_v63, %v364_v63  ;;  %v525_v1 = vpack.c.bf16 %v372_v0, %v372_v0 }
 0x11f   :  { %445 = vst.msk [vmem:[%s805_s4 + $0x1c] sm:$0xf] %vm437_vm3, %v517_v31  ;;  %453 = vst.msk [vmem:[%s805_s4 + $0x3c] sm:$0xf] %vm437_vm3, %v525_v1 }

</bundles_post_ra>
